<compile_context>
chip_gen: v5e
topology: v5e:2x2
jax: 0.10.0
libtpu: 0.0.40
codegen_flags: <defaults>
</compile_context>

<pallas_src>
import functools
import math

import jax
import jax.numpy as jnp
from jax.experimental import pallas as pl
from jax.experimental.pallas import tpu as pltpu

_LANE = 128
_SUBLANE = 8


def _layernorm_kernel(x_ref, w_ref, b_ref, o_ref, *, eps, inv_h):
    # x_ref: (TILE_ROWS, H), w_ref/b_ref: (1, H), o_ref: (TILE_ROWS, H)
    x = x_ref[...].astype(jnp.float32)
    mean = jnp.sum(x, axis=-1, keepdims=True) * inv_h       # XLU reduce
    xc = x - mean
    var = jnp.sum(xc * xc, axis=-1, keepdims=True) * inv_h  # centered: no cancellation
    inv = jax.lax.rsqrt(var + eps)                           # TF-style: eps inside sqrt; EUP
    w = w_ref[...].astype(jnp.float32)
    b = b_ref[...].astype(jnp.float32)
    o_ref[...] = (w * (xc * inv) + b).astype(o_ref.dtype)


def _vmem_limit_cap():
    """Scoped-VMEM cap derived from hardware: ~48 MiB on v7x, 64 MiB on v5e/v6e."""
    try:
        cap = int(pltpu.get_tpu_info().vmem_capacity_bytes)
    except Exception:  # pragma: no cover - conservative fallback (v7x-sized)
        cap = 64 << 20
    return int(min((cap * 3) // 4, 64 << 20))


def _choose_tile_rows(rows, hidden, in_itemsize, out_itemsize, vmem_cap,
                      max_tile_rows=2048, min_grid_steps=4):
    """Largest multiple-of-8 row tile that fits the VMEM budget, while keeping
    enough grid steps for megacore sharding on v7x."""
    # double-buffered in + out tiles + ~3 f32 in-kernel temps (upcast, xc, out)
    bytes_per_row = hidden * (2 * in_itemsize + 2 * out_itemsize + 3 * 4)
    budget = max(int(vmem_cap * 0.6), 4 << 20)
    t = min(max_tile_rows, max(budget // max(bytes_per_row, 1), _SUBLANE))
    # Keep >= min_grid_steps steps (when rows allow) so the "parallel" row axis
    # can actually shard across both v7x TensorCores.
    if rows >= min_grid_steps * _SUBLANE:
        t = min(t, -(-rows // min_grid_steps))
    rows_up = ((rows + _SUBLANE - 1) // _SUBLANE) * _SUBLANE
    t = min(t, rows_up)                         # don't exceed the data
    t = max(_SUBLANE, (t // _SUBLANE) * _SUBLANE)
    return int(t)


def bert_layer_norm(x, weight, bias, eps=1e-12, tile_rows=None):
    """x: (..., hidden). weight/bias: (hidden,). Returns same shape/dtype as x."""
    orig_shape = x.shape
    hidden = orig_shape[-1]
    rows = int(math.prod(orig_shape[:-1])) if len(orig_shape) > 1 else 1

    out_dtype = x.dtype
    in_isz = jnp.dtype(x.dtype).itemsize
    out_isz = jnp.dtype(out_dtype).itemsize

    vmem_cap = _vmem_limit_cap()
    if tile_rows is None:
        tile_rows = _choose_tile_rows(rows, hidden, in_isz, out_isz, vmem_cap)
    tile_rows = max(_SUBLANE, (tile_rows // _SUBLANE) * _SUBLANE)

    grid_steps = pl.cdiv(rows, tile_rows)

    # Pure-reshape wrapper: no pads, no output slice.  Block last dim is the
    # full hidden extent (valid even when hidden % 128 != 0).
    x2 = x.reshape(rows, hidden)
    w2 = weight.reshape(1, hidden)
    b2 = bias.reshape(1, hidden)

    tile_bytes = tile_rows * hidden
    needed = (tile_bytes * (2 * in_isz + 2 * out_isz + 3 * 4)
              + 4 * hidden * 4 + (2 << 20))
    vmem_limit = int(min(max(needed, 16 << 20), vmem_cap))

    kernel = functools.partial(_layernorm_kernel, eps=float(eps),
                               inv_h=1.0 / float(hidden))

    out = pl.pallas_call(
        kernel,
        out_shape=jax.ShapeDtypeStruct((rows, hidden), out_dtype),
        grid_spec=pltpu.PrefetchScalarGridSpec(
            num_scalar_prefetch=0,
            grid=(grid_steps,),
            in_specs=[
                pl.BlockSpec((tile_rows, hidden), lambda i: (i, 0)),
                pl.BlockSpec((1, hidden), lambda i: (0, 0)),   # resident weight
                pl.BlockSpec((1, hidden), lambda i: (0, 0)),   # resident bias
            ],
            out_specs=pl.BlockSpec((tile_rows, hidden), lambda i: (i, 0)),
        ),
        compiler_params=pltpu.CompilerParams(
            dimension_semantics=("parallel",),
            vmem_limit_bytes=vmem_limit,
        ),
    )(x2, w2, b2)

    return out.reshape(orig_shape)


if __name__ == "__main__":
    key = jax.random.PRNGKey(0)
    batch, seq, hidden = 2, 8, 32

    kx, kw, kb = jax.random.split(key, 3)
    x = jax.random.normal(kx, (batch, seq, hidden), dtype=jnp.float32)

    def ref_ln(x, w, b, eps=1e-12):
        u = jnp.mean(x, axis=-1, keepdims=True)
        s = jnp.mean((x - u) ** 2, axis=-1, keepdims=True)
        return w * ((x - u) / jnp.sqrt(s + eps)) + b

    # 1) Parameters exactly as the module's init (ones / zeros).
    weight = jnp.ones((hidden,), dtype=jnp.float32)
    bias = jnp.zeros((hidden,), dtype=jnp.float32)
    out = jax.block_until_ready(bert_layer_norm(x, weight, bias, eps=1e-12))
    assert jnp.allclose(out, ref_ln(x, weight, bias), atol=1e-5, rtol=1e-5), \
        "mismatch vs reference (unit affine)"

    # 2) Non-trivial (deterministic) affine params to exercise weight/bias path.
    weight2 = jax.random.normal(kw, (hidden,), dtype=jnp.float32)
    bias2 = jax.random.normal(kb, (hidden,), dtype=jnp.float32)
    out2 = jax.block_until_ready(bert_layer_norm(x, weight2, bias2, eps=1e-12))
    assert jnp.allclose(out2, ref_ln(x, weight2, bias2), atol=1e-5, rtol=1e-5), \
        "mismatch vs reference (random affine)"

    # 3) Shape that does not divide the row tile (exercises boundary-block path).
    x3 = jax.random.normal(kx, (3, 5, hidden), dtype=jnp.float32)
    out3 = jax.block_until_ready(
        bert_layer_norm(x3, weight2, bias2, eps=1e-12, tile_rows=8))
    assert jnp.allclose(out3, ref_ln(x3, weight2, bias2), atol=1e-5, rtol=1e-5), \
        "mismatch vs reference (non-dividing rows)"

    print("KERNEL_OK")
</pallas_src>

<mosaic_0001>
module attributes {stable_mosaic.version = 11 : i64} {
  func.func @_layernorm_kernel(%arg0: i32, %arg1: memref<16x32xf32, #tpu.memory_space<vmem>>, %arg2: memref<1x32xf32, #tpu.memory_space<vmem>>, %arg3: memref<1x32xf32, #tpu.memory_space<vmem>>, %arg4: memref<16x32xf32, #tpu.memory_space<vmem>>) attributes {dimension_semantics = [#tpu.dimension_semantics<parallel>], iteration_bounds = array<i64: 1>, scalar_prefetch = 0 : i64, scratch_operands = 0 : i64, tpu.core_type = #tpu.core_type<tc>, window_params = [{transform_indices = @transform_0, window_bounds = array<i64: 16, 32>}, {pipeline_mode = #tpu.pipeline_mode<synchronous>, transform_indices = @transform_1, window_bounds = array<i64: 1, 32>}, {pipeline_mode = #tpu.pipeline_mode<synchronous>, transform_indices = @transform_2, window_bounds = array<i64: 1, 32>}, {transform_indices = @transform_3, window_bounds = array<i64: 16, 32>}]} {
    %c0 = arith.constant 0 : index
    %c0_0 = arith.constant 0 : index
    %0 = vector.load %arg1[%c0, %c0_0] : memref<16x32xf32, #tpu.memory_space<vmem>>, vector<16x32xf32>
    %cst = arith.constant dense<0.000000e+00> : vector<16xf32>
    %1 = vector.multi_reduction <add>, %0, %cst [1] : vector<16x32xf32> to vector<16xf32>
    %2 = vector.shape_cast %1 : vector<16xf32> to vector<16x1xf32>
    %cst_1 = arith.constant 3.125000e-02 : f32
    %3 = vector.broadcast %cst_1 : f32 to vector<16x1xf32>
    %4 = arith.mulf %2, %3 : vector<16x1xf32>
    %5 = vector.broadcast %4 : vector<16x1xf32> to vector<16x32xf32>
    %6 = arith.subf %0, %5 : vector<16x32xf32>
    %7 = arith.mulf %6, %6 : vector<16x32xf32>
    %cst_2 = arith.constant dense<0.000000e+00> : vector<16xf32>
    %8 = vector.multi_reduction <add>, %7, %cst_2 [1] : vector<16x32xf32> to vector<16xf32>
    %9 = vector.shape_cast %8 : vector<16xf32> to vector<16x1xf32>
    %cst_3 = arith.constant 3.125000e-02 : f32
    %10 = vector.broadcast %cst_3 : f32 to vector<16x1xf32>
    %11 = arith.mulf %9, %10 : vector<16x1xf32>
    %cst_4 = arith.constant 9.99999996E-13 : f32
    %12 = vector.broadcast %cst_4 : f32 to vector<16x1xf32>
    %13 = arith.addf %11, %12 : vector<16x1xf32>
    %14 = math.rsqrt %13 : vector<16x1xf32>
    %c0_5 = arith.constant 0 : index
    %c0_6 = arith.constant 0 : index
    %15 = vector.load %arg2[%c0_5, %c0_6] : memref<1x32xf32, #tpu.memory_space<vmem>>, vector<1x32xf32>
    %c0_7 = arith.constant 0 : index
    %c0_8 = arith.constant 0 : index
    %16 = vector.load %arg3[%c0_7, %c0_8] : memref<1x32xf32, #tpu.memory_space<vmem>>, vector<1x32xf32>
    %17 = vector.broadcast %14 : vector<16x1xf32> to vector<16x32xf32>
    %18 = arith.mulf %6, %17 : vector<16x32xf32>
    %19 = vector.broadcast %15 : vector<1x32xf32> to vector<16x32xf32>
    %20 = arith.mulf %19, %18 : vector<16x32xf32>
    %21 = vector.broadcast %16 : vector<1x32xf32> to vector<16x32xf32>
    %22 = arith.addf %20, %21 : vector<16x32xf32>
    %c0_9 = arith.constant 0 : index
    %c0_10 = arith.constant 0 : index
    %23 = vector.load %arg4[%c0_9, %c0_10] : memref<16x32xf32, #tpu.memory_space<vmem>>, vector<16x32xf32>
    tpu.vector_store %arg4[%c0_9, %c0_10], %22 {strides = array<i32>} : memref<16x32xf32, #tpu.memory_space<vmem>>, vector<16x32xf32>,
    return
  }
  func.func @transform_0(%arg0: i32) -> (i32, i32) {
    %c0_i32 = arith.constant 0 : i32
    %c0_i32_0 = arith.constant 0 : i32
    return %arg0, %c0_i32 : i32, i32
  }
  func.func @transform_1(%arg0: i32) -> (i32, i32) {
    %c0_i32 = arith.constant 0 : i32
    %c0_i32_0 = arith.constant 0 : i32
    %c0_i32_1 = arith.constant 0 : i32
    return %c0_i32, %c0_i32_0 : i32, i32
  }
  func.func @transform_2(%arg0: i32) -> (i32, i32) {
    %c0_i32 = arith.constant 0 : i32
    %c0_i32_0 = arith.constant 0 : i32
    %c0_i32_1 = arith.constant 0 : i32
    return %c0_i32, %c0_i32_0 : i32, i32
  }
  func.func @transform_3(%arg0: i32) -> (i32, i32) {
    %c0_i32 = arith.constant 0 : i32
    %c0_i32_0 = arith.constant 0 : i32
    return %arg0, %c0_i32 : i32, i32
  }
}

</mosaic_0001>

<bundles_post_ra>
// kernel: tpu_custom_call.1
= control target key start
LH: loop header
LB: loop body
LE: loop exit
PB: predicated region body
PF: predicated region fallthrough
CT: control target
= control target key end

     0   :  { %8 = vsyncpa [#allocation3], 0  ;;  %s264_s0 = inlined_call_operand.hbm [shape: f32[16,32], index: 0, kind: input, shape index: {}]   ;;  %s265_s1 = inlined_call_operand.hbm [shape: f32[1,32], index: 1, kind: input, shape index: {}]   ;;  %s266_s2 = inlined_call_operand.vmem [shape: f32[1,32], index: 2, kind: input, shape index: {}]   ;;  %s267_s3 = inlined_call_operand.hbm [shape: f32[16,32], index: 3, kind: output, shape index: {}]  }
   0x1   :  { %9 = vsyncpa [#allocation6], 0 }
   0x2   :  { %10 = vsyncpa [#allocation4], 0  ;;  %s15_s14 = sshll.u32 %s264_s0, 4  ;;  %s215_s15 = smov [#allocation2]   ;;  %s16_s14 = int_to_ptr.hbm [resolvable:$true] %s15_s14 }
   0x3   :  { %s17_s16 = sshll.u32 %s215_s15, 4  ;;  %s29_s19 = sshll.u32 %s265_s1, 4  ;;  %s18_s16 = int_to_ptr.vmem [resolvable:$true] %s17_s16  ;;  %s30_s19 = int_to_ptr.hbm [resolvable:$true] %s29_s19 }
   0x4   :  { %s216_s20 = smov 128   ;;  %s217_s21 = smov 8  }
   0x5   :  { %23 = dma.hbm_to_vmem [thread:$0]  %s16_s14, 256, %s18_s16, [#allocation3], %s216_s20, %s216_s20, %s217_s21  }
   0x6   :  { %s218_s22 = smov [#allocation5]  }
   0x7   :  { %s31_s23 = sshll.u32 %s218_s22, 4  ;;  %s32_s23 = int_to_ptr.vmem [resolvable:$true] %s31_s23 }
   0x8   :  { %34 = dma.hbm_to_vmem [thread:$0]  %s30_s19, 16, %s32_s23, [#allocation6]  }
   0x9   :  { %209 = dma.done.wait [#allocation3], 256  }
   0xa   :  { %210 = vsyncadd [#allocation3], 4294967040 }
   0xb   :  { %211 = dma.done.wait [#allocation6], 16  }
   0xc   :  { %212 = vsyncadd [#allocation6], 4294967280  ;;  %vm47_vm0 = vcmask 261120   ;;  %v45_v0 = vld [vmem:[#allocation2] sm:$0xff]  ;;  %v46_v2 = vld [vmem:[#allocation2 + $0x8] sm:$0xff]  ;;  %s219_s24 = smov [#allocation7]  }
   0xd   :  { %v48_v1 = vsel %vm47_vm0, %v45_v0, 0.0  ;;  %v51_v3 = vsel %vm47_vm0, %v46_v2, 0.0  ;;  %v131_v28 = vld [vmem:[#allocation5] ss:$0 sm:$0xff]  ;;  %v132_v32 = vld [vmem:[%s266_s2] ss:$0 sm:$0xff] }
   0xe   :  { %49 = vadd.xlane.f32.xlu0 %v48_v1  ;;  %s110_s25 = sshll.u32 %s219_s24, 4  ;;  %s112_s28 = sshll.u32 %s267_s3, 4  ;;  %s111_s25 = int_to_ptr.vmem [resolvable:$true] %s110_s25  ;;  %s113_s28 = int_to_ptr.hbm [resolvable:$true] %s112_s28 }
  0x16   :  { %52 = vadd.xlane.f32.xlu0 %v51_v3 }
  0x81   :  { %v50_v4 = vpop.xlane.xlu0 %49 }
  0x82   :  { %v54_v5 = vmul.f32 0.03125, %v50_v4 }
  0x84   :  { %v56_v6 = vsub.f32 %v45_v0, %v54_v5 }
  0x86   :  { %v58_v7 = vmul.f32 %v56_v6, %v56_v6 }
  0x88   :  { %v60_v8 = vsel %vm47_vm0, %v58_v7, 0.0 }
  0x89   :  { %61 = vadd.xlane.f32.xlu1 %v60_v8  ;;  %v53_v9 = vpop.xlane.xlu0 %52 }
  0x8a   :  { %v55_v10 = vmul.f32 0.03125, %v53_v9 }
  0x8c   :  { %v57_v11 = vsub.f32 %v46_v2, %v55_v10 }
  0x8e   :  { %v59_v12 = vmul.f32 %v57_v11, %v57_v11 }
  0x90   :  { %v63_v13 = vsel %vm47_vm0, %v59_v12, 0.0 }
  0x91   :  { %64 = vadd.xlane.f32.xlu1 %v63_v13 }
  0xfc   :  { %v62_v14 = vpop.xlane.xlu1 %61 }
  0xfd   :  { %v66_v15 = vmul.f32 0.03125, %v62_v14 }
  0xff   :  { %v68_v16 = vadd.f32 1e-12, %v66_v15 }
 0x101   :  { %133 = vrsqrt.f32 %v68_v16  ;;  %vm76_vm2 = vweird.f32 %v68_v16 }
 0x104   :  { %v65_v17 = vpop.xlane.xlu1 %64 }
 0x105   :  { %v67_v18 = vmul.f32 0.03125, %v65_v17 }
 0x107   :  { %v134_v19 = vpop.eup %133  ;;  %v69_v20 = vadd.f32 1e-12, %v67_v18 }
 0x108   :  { %v71_v21 = vmul.f32 %v134_v19, %v68_v16  ;;  %vm77_vm1 = vweird.f32 %v134_v19 }
 0x109   :  { %135 = vrsqrt.f32 %v69_v20  ;;  %vm78_vm3 = vmor %vm76_vm2, %vm77_vm1  ;;  %vm86_vm5 = vweird.f32 %v69_v20 }
 0x10a   :  { %v72_v22 = vmul.f32 %v134_v19, %v71_v21 }
 0x10c   :  { %v73_v23 = vmul.f32 0.5, %v72_v22 }
 0x10e   :  { %v74_v24 = vsub.f32 1.5, %v73_v23 }
 0x10f   :  { %v136_v25 = vpop.eup %135 }
 0x110   :  { %v75_v26 = vmul.f32 %v134_v19, %v74_v24  ;;  %v81_v27 = vmul.f32 %v136_v25, %v69_v20  ;;  %vm87_vm4 = vweird.f32 %v136_v25 }
 0x111   :  { %vm88_vm6 = vmor %vm86_vm5, %vm87_vm4 }
 0x112   :  { %v79_v29 = vsel %vm78_vm3, %v134_v19, %v75_v26  ;;  %v82_v30 = vmul.f32 %v136_v25, %v81_v27 }
 0x113   :  { %v92_v31 = vmul.f32 %v79_v29, %v56_v6 }
 0x114   :  { %v83_v33 = vmul.f32 0.5, %v82_v30 }
 0x115   :  { %v97_v34 = vmul.f32 %v131_v28, %v92_v31 }
 0x116   :  { %v84_v35 = vsub.f32 1.5, %v83_v33 }
 0x117   :  { %v102_v36 = vadd.f32 %v132_v32, %v97_v34 }
 0x118   :  { %v85_v37 = vmul.f32 %v136_v25, %v84_v35 }
 0x119   :  { %104 = vst.msk [vmem:[#allocation7] sm:$0xff] %vm47_vm0, %v102_v36 }
 0x11a   :  { %v89_v38 = vsel %vm88_vm6, %v136_v25, %v85_v37 }
 0x11b   :  { %v93_v39 = vmul.f32 %v89_v38, %v57_v11 }
 0x11d   :  { %v98_v40 = vmul.f32 %v131_v28, %v93_v39 }
 0x11f   :  { %v103_v41 = vadd.f32 %v132_v32, %v98_v40 }
 0x121   :  { %105 = vst.msk [vmem:[#allocation7 + $0x8] sm:$0xff] %vm47_vm0, %v103_v41 }
 0x122   :  { %118 = dma.vmem_to_hbm [thread:$0]  %s111_s25, 256, %s113_s28, [#allocation4], %s216_s20, %s216_s20, %s217_s21  }
 0x123   :  { %213 = dma.done.wait [#allocation4], 256  }
 0x124   :  { %214 = vsyncadd [#allocation4], 4294967040 }
 0x125   :  { %123 = vsyncpa [#allocation3], 1 }
 0x126   :  { %124 = vsyncpa [#allocation6], 1 }
 0x127   :  { %125 = vsyncpa [#allocation4], 1 }

</bundles_post_ra>
